<compile_context>
chip_gen: v7x
topology: tpu7x:2x2x1
jax: 0.10.0
libtpu: 0.0.40
codegen_flags: <defaults>
</compile_context>

<pallas_src>
import functools

import jax
import jax.numpy as jnp
from jax import lax
from jax.experimental import pallas as pl
from jax.experimental.pallas import tpu as pltpu

LANE = 128
N_STATS = 8                 # [Npx, sum|e|, sum e^2, bad@0.5, bad@1, bad@2, bad@3, pad]
BAD_THS = (0.5, 1.0, 2.0, 3.0)
TARGET_ROWS = 2048          # rows per block: 2048*128*4B = 1 MiB/buffer (f32)


def _make_kernel(block_rows, rows, n_inner):
    """Kernel factory closing over static tiling parameters."""

    def kernel(pred_ref, gt_ref, out_ref):
        # grid = (B, n_outer, n_inner); out block is resident across the inner axis.
        o = pl.program_id(1)
        i = pl.program_id(2)
        chunk = o * n_inner + i  # logical chunk index (may overflow -> fully masked)

        @pl.when(i == 0)
        def _init():
            out_ref[...] = jnp.zeros_like(out_ref)

        gt = gt_ref[0].astype(jnp.float32)      # (block_rows, LANE)
        pred = pred_ref[0].astype(jnp.float32)  # (block_rows, LANE)

        # isfinite for floats: NaN/±inf -> False.
        finite = jnp.abs(gt) < jnp.float32(jnp.inf)
        # Mask rows past the end of the image (ragged last block / clamped overflow steps).
        row_ids = lax.broadcasted_iota(jnp.int32, (block_rows, 1), 0)
        rows_left = rows - chunk * block_rows   # traced scalar; <= 0 => whole block masked
        valid = finite & (row_ids < rows_left)

        dm = jnp.where(valid, gt - pred, jnp.float32(0.0))
        l1 = jnp.abs(dm)
        l2 = dm * dm

        parts = [
            jnp.sum(valid.astype(jnp.float32), axis=0, keepdims=True),  # Npx
            jnp.sum(l1, axis=0, keepdims=True),                         # sum |err|
            jnp.sum(l2, axis=0, keepdims=True),                         # sum err^2
        ]
        for ths in BAD_THS:
            # l1 == 0 at masked pixels, so (l1 > ths) is already False there.
            parts.append(jnp.sum((l1 > jnp.float32(ths)).astype(jnp.float32),
                                 axis=0, keepdims=True))
        parts.append(jnp.zeros((1, LANE), jnp.float32))                 # pad row -> 8 sublanes

        slab = jnp.concatenate(parts, axis=0)   # (N_STATS, LANE)
        out_ref[0, 0] += slab                   # single whole-tile update per step

    return kernel


@jax.jit
def stereo_metrics(predictions, gt):
    """Pallas implementation of StereoMetrics.forward (do_quantile=False)."""
    B = predictions.shape[0]
    pred_flat = predictions.reshape(B, -1)
    gt_flat = gt.reshape(B, -1)
    # Keep bf16/f32 native (halves HBM traffic for bf16); upcast anything else.
    if pred_flat.dtype not in (jnp.float32, jnp.bfloat16):
        pred_flat = pred_flat.astype(jnp.float32)
    if gt_flat.dtype not in (jnp.float32, jnp.bfloat16):
        gt_flat = gt_flat.astype(jnp.float32)
    N = pred_flat.shape[1]

    # Sublane-tile multiple: 8 for 4-byte, 16 if any 2-byte dtype is involved.
    sub_mult = 8 if (pred_flat.dtype.itemsize == 4 and gt_flat.dtype.itemsize == 4) else 16

    rows = pl.cdiv(N, LANE)
    rows = pl.cdiv(rows, sub_mult) * sub_mult
    padded = rows * LANE
    if padded != N:
        # Only the single trailing tile is padded; gt pad = NaN so it is masked in-kernel.
        # TODO(synk): for N already a multiple of sub_mult*LANE this branch (and its copy)
        # is skipped entirely.
        pred_flat = jnp.pad(pred_flat, ((0, 0), (0, padded - N)))
        gt_flat = jnp.pad(gt_flat, ((0, 0), (0, padded - N)), constant_values=jnp.nan)

    pred3 = pred_flat.reshape(B, rows, LANE)
    gt3 = gt_flat.reshape(B, rows, LANE)

    block_rows = min(TARGET_ROWS, rows)          # multiple of sub_mult by construction
    n_chunks = pl.cdiv(rows, block_rows)
    n_outer = min(2, n_chunks)                   # megacore-friendly split (v7x)
    n_inner = pl.cdiv(n_chunks, n_outer)

    def in_map(b, o, i):
        # Clamp overflow steps onto the last real block; kernel masks them to zero.
        return (b, jnp.minimum(o * n_inner + i, n_chunks - 1), 0)

    def out_map(b, o, i):
        return (b, o, 0, 0)

    stats_lanes = pl.pallas_call(
        _make_kernel(block_rows, rows, n_inner),
        out_shape=jax.ShapeDtypeStruct((B, n_outer, N_STATS, LANE), jnp.float32),
        grid_spec=pltpu.PrefetchScalarGridSpec(
            num_scalar_prefetch=0,
            grid=(B, n_outer, n_inner),
            in_specs=[
                pl.BlockSpec((1, block_rows, LANE), in_map),
                pl.BlockSpec((1, block_rows, LANE), in_map),
            ],
            out_specs=pl.BlockSpec((1, 1, N_STATS, LANE), out_map),
        ),
        compiler_params=pltpu.CompilerParams(
            dimension_semantics=("parallel", "parallel", "arbitrary")),
    )(pred3, gt3)

    # Tiny glue: sum outer splits and lanes, then the per-batch divisions / batch means.
    stats = jnp.sum(stats_lanes, axis=(1, 3))    # (B, N_STATS)
    npx = stats[:, 0]
    metrics = {
        'avgerr': jnp.mean(stats[:, 1] / npx),
        'rmse': jnp.mean(jnp.sqrt(stats[:, 2] / npx)),
    }
    for k, ths in enumerate(BAD_THS):
        metrics['bad@{:.1f}'.format(ths)] = jnp.mean(stats[:, 3 + k] / npx) * 100.0
    return metrics


def _reference_metrics(predictions, gt):
    """Pure-JAX mirror of the PyTorch forward for verification."""
    B = predictions.shape[0]
    mask = jnp.isfinite(gt)
    gtc = jnp.where(mask, gt, 999999.0)
    npx = mask.reshape(B, -1).sum(axis=1).astype(jnp.float32)
    l1 = (jnp.abs(gtc - predictions) * mask).reshape(B, -1)
    l2 = (jnp.square(gtc - predictions) * mask).reshape(B, -1)
    out = {
        'avgerr': jnp.mean(l1.sum(axis=1) / npx),
        'rmse': jnp.mean(jnp.sqrt(l2.sum(axis=1) / npx)),
    }
    for ths in BAD_THS:
        out['bad@{:.1f}'.format(ths)] = jnp.mean(
            ((l1 > ths) * mask.reshape(B, -1)).sum(axis=1) / npx) * 100.0
    return out


if __name__ == "__main__":
    # StereoMetrics has no learnable parameters; do_quantile=False path only.
    key = jax.random.PRNGKey(0)
    k1, k2 = jax.random.split(key)
    B, C, H, W = 2, 1, 16, 16  # disparity-map style input (NCHW)

    gt = jax.random.uniform(k1, (B, C, H, W), jnp.float32, 0.0, 8.0)
    predictions = gt + jax.random.normal(k2, (B, C, H, W), jnp.float32) * 1.5

    # Inject invalid ground-truth pixels (inf / nan) to exercise the mask path.
    gt = gt.at[0, 0, 0, :5].set(jnp.inf)
    gt = gt.at[1, 0, 3, 7].set(jnp.nan)
    gt = gt.at[1, 0, 10, :].set(-jnp.inf)

    metrics = stereo_metrics(predictions, gt)
    metrics = {k: jax.block_until_ready(v) for k, v in metrics.items()}

    ref = _reference_metrics(predictions, gt)
    for k in ref:
        assert jnp.allclose(metrics[k], ref[k], rtol=1e-5, atol=1e-5), (
            k, metrics[k], ref[k])

    print("KERNEL_OK")
</pallas_src>

<mosaic_0001>
module attributes {stable_mosaic.version = 11 : i64} {
  func.func @kernel(%arg0: i32, %arg1: i32, %arg2: i32, %arg3: memref<1x8x128xf32, #tpu.memory_space<vmem>>, %arg4: memref<1x8x128xf32, #tpu.memory_space<vmem>>, %arg5: memref<1x1x8x128xf32, #tpu.memory_space<vmem>>) attributes {dimension_semantics = [#tpu.dimension_semantics<parallel>, #tpu.dimension_semantics<parallel>, #tpu.dimension_semantics<arbitrary>], iteration_bounds = array<i64: 2, 1, 1>, scalar_prefetch = 0 : i64, scratch_operands = 0 : i64, tpu.core_type = #tpu.core_type<tc>, window_params = [{transform_indices = @transform_0, window_bounds = array<i64: 1, 8, 128>}, {transform_indices = @transform_1, window_bounds = array<i64: 1, 8, 128>}, {transform_indices = @transform_2, window_bounds = array<i64: 1, 1, 8, 128>}]} {
    %c1_i32 = arith.constant 1 : i32
    %0 = arith.muli %arg1, %c1_i32 : i32
    %1 = arith.addi %0, %arg2 : i32
    %c0_i32 = arith.constant 0 : i32
    %2 = arith.cmpi eq, %arg2, %c0_i32 : i32
    %3 = arith.extui %2 : i1 to i32
    %c0_i32_0 = arith.constant 0 : i32
    %4 = arith.cmpi ne, %3, %c0_i32_0 : i32
    scf.if %4 {
      %cst_28 = arith.constant 0.000000e+00 : f32
      %64 = vector.broadcast %cst_28 : f32 to vector<1x1x8x128xf32>
      %c0_29 = arith.constant 0 : index
      %c0_30 = arith.constant 0 : index
      %c0_31 = arith.constant 0 : index
      %c0_32 = arith.constant 0 : index
      %65 = vector.load %arg5[%c0_29, %c0_30, %c0_31, %c0_32] : memref<1x1x8x128xf32, #tpu.memory_space<vmem>>, vector<1x1x8x128xf32>
      tpu.vector_store %arg5[%c0_29, %c0_30, %c0_31, %c0_32], %64 {strides = array<i32>} : memref<1x1x8x128xf32, #tpu.memory_space<vmem>>, vector<1x1x8x128xf32>,
    } else {
    }
    %c0 = arith.constant 0 : index
    %c0_1 = arith.constant 0 : index
    %c0_2 = arith.constant 0 : index
    %5 = vector.load %arg4[%c0, %c0_1, %c0_2] : memref<1x8x128xf32, #tpu.memory_space<vmem>>, vector<1x8x128xf32>
    %6 = vector.shape_cast %5 : vector<1x8x128xf32> to vector<8x128xf32>
    %c0_3 = arith.constant 0 : index
    %c0_4 = arith.constant 0 : index
    %c0_5 = arith.constant 0 : index
    %7 = vector.load %arg3[%c0_3, %c0_4, %c0_5] : memref<1x8x128xf32, #tpu.memory_space<vmem>>, vector<1x8x128xf32>
    %8 = vector.shape_cast %7 : vector<1x8x128xf32> to vector<8x128xf32>
    %9 = math.absf %6 : vector<8x128xf32>
    %cst = arith.constant 0x7F800000 : f32
    %10 = vector.broadcast %cst : f32 to vector<8x128xf32>
    %11 = arith.cmpf olt, %9, %10 : vector<8x128xf32>
    %12 = tpu.iota {dimensions = array<i32: 0>} : vector<8x1xi32>
    %c8_i32 = arith.constant 8 : i32
    %13 = arith.muli %1, %c8_i32 : i32
    %c8_i32_6 = arith.constant 8 : i32
    %14 = arith.subi %c8_i32_6, %13 : i32
    %15 = vector.broadcast %14 : i32 to vector<8x1xi32>
    %16 = arith.cmpi slt, %12, %15 : vector<8x1xi32>
    %17 = vector.broadcast %16 : vector<8x1xi1> to vector<8x128xi1>
    %18 = arith.andi %11, %17 : vector<8x128xi1>
    %19 = arith.subf %6, %8 : vector<8x128xf32>
    %cst_7 = arith.constant 0.000000e+00 : f32
    %20 = vector.broadcast %cst_7 : f32 to vector<8x128xf32>
    %21 = arith.select %18, %19, %20 : vector<8x128xi1>, vector<8x128xf32>
    %22 = math.absf %21 : vector<8x128xf32>
    %23 = arith.mulf %21, %21 : vector<8x128xf32>
    %24 = arith.extui %18 : vector<8x128xi1> to vector<8x128xi32>
    %25 = arith.sitofp %24 : vector<8x128xi32> to vector<8x128xf32>
    %cst_8 = arith.constant dense<0.000000e+00> : vector<128xf32>
    %26 = vector.multi_reduction <add>, %25, %cst_8 [0] : vector<8x128xf32> to vector<128xf32>
    %27 = vector.shape_cast %26 : vector<128xf32> to vector<1x128xf32>
    %cst_9 = arith.constant dense<0.000000e+00> : vector<128xf32>
    %28 = vector.multi_reduction <add>, %22, %cst_9 [0] : vector<8x128xf32> to vector<128xf32>
    %29 = vector.shape_cast %28 : vector<128xf32> to vector<1x128xf32>
    %cst_10 = arith.constant dense<0.000000e+00> : vector<128xf32>
    %30 = vector.multi_reduction <add>, %23, %cst_10 [0] : vector<8x128xf32> to vector<128xf32>
    %31 = vector.shape_cast %30 : vector<128xf32> to vector<1x128xf32>
    %cst_11 = arith.constant 5.000000e-01 : f32
    %32 = vector.broadcast %cst_11 : f32 to vector<8x128xf32>
    %33 = arith.cmpf ogt, %22, %32 : vector<8x128xf32>
    %34 = arith.extui %33 : vector<8x128xi1> to vector<8x128xi32>
    %35 = arith.sitofp %34 : vector<8x128xi32> to vector<8x128xf32>
    %cst_12 = arith.constant dense<0.000000e+00> : vector<128xf32>
    %36 = vector.multi_reduction <add>, %35, %cst_12 [0] : vector<8x128xf32> to vector<128xf32>
    %37 = vector.shape_cast %36 : vector<128xf32> to vector<1x128xf32>
    %cst_13 = arith.constant 1.000000e+00 : f32
    %38 = vector.broadcast %cst_13 : f32 to vector<8x128xf32>
    %39 = arith.cmpf ogt, %22, %38 : vector<8x128xf32>
    %40 = arith.extui %39 : vector<8x128xi1> to vector<8x128xi32>
    %41 = arith.sitofp %40 : vector<8x128xi32> to vector<8x128xf32>
    %cst_14 = arith.constant dense<0.000000e+00> : vector<128xf32>
    %42 = vector.multi_reduction <add>, %41, %cst_14 [0] : vector<8x128xf32> to vector<128xf32>
    %43 = vector.shape_cast %42 : vector<128xf32> to vector<1x128xf32>
    %cst_15 = arith.constant 2.000000e+00 : f32
    %44 = vector.broadcast %cst_15 : f32 to vector<8x128xf32>
    %45 = arith.cmpf ogt, %22, %44 : vector<8x128xf32>
    %46 = arith.extui %45 : vector<8x128xi1> to vector<8x128xi32>
    %47 = arith.sitofp %46 : vector<8x128xi32> to vector<8x128xf32>
    %cst_16 = arith.constant dense<0.000000e+00> : vector<128xf32>
    %48 = vector.multi_reduction <add>, %47, %cst_16 [0] : vector<8x128xf32> to vector<128xf32>
    %49 = vector.shape_cast %48 : vector<128xf32> to vector<1x128xf32>
    %cst_17 = arith.constant 3.000000e+00 : f32
    %50 = vector.broadcast %cst_17 : f32 to vector<8x128xf32>
    %51 = arith.cmpf ogt, %22, %50 : vector<8x128xf32>
    %52 = arith.extui %51 : vector<8x128xi1> to vector<8x128xi32>
    %53 = arith.sitofp %52 : vector<8x128xi32> to vector<8x128xf32>
    %cst_18 = arith.constant dense<0.000000e+00> : vector<128xf32>
    %54 = vector.multi_reduction <add>, %53, %cst_18 [0] : vector<8x128xf32> to vector<128xf32>
    %55 = vector.shape_cast %54 : vector<128xf32> to vector<1x128xf32>
    %cst_19 = arith.constant 0.000000e+00 : f32
    %56 = vector.broadcast %cst_19 : f32 to vector<1x128xf32>
    %57 = tpu.concatenate %27, %29, %31, %37, %43, %49, %55, %56 in 0 : vector<1x128xf32>, vector<1x128xf32>, vector<1x128xf32>, vector<1x128xf32>, vector<1x128xf32>, vector<1x128xf32>, vector<1x128xf32>, vector<1x128xf32> -> vector<8x128xf32>
    %c0_20 = arith.constant 0 : index
    %c0_21 = arith.constant 0 : index
    %c0_22 = arith.constant 0 : index
    %c0_23 = arith.constant 0 : index
    %58 = vector.load %arg5[%c0_20, %c0_21, %c0_22, %c0_23] : memref<1x1x8x128xf32, #tpu.memory_space<vmem>>, vector<1x1x8x128xf32>
    %59 = vector.shape_cast %58 : vector<1x1x8x128xf32> to vector<8x128xf32>
    %60 = arith.addf %59, %57 : vector<8x128xf32>
    %c0_24 = arith.constant 0 : index
    %c0_25 = arith.constant 0 : index
    %c0_26 = arith.constant 0 : index
    %c0_27 = arith.constant 0 : index
    %61 = vector.load %arg5[%c0_24, %c0_25, %c0_26, %c0_27] : memref<1x1x8x128xf32, #tpu.memory_space<vmem>>, vector<1x1x8x128xf32>
    %62 = vector.shape_cast %61 : vector<1x1x8x128xf32> to vector<8x128xf32>
    %63 = vector.shape_cast %60 : vector<8x128xf32> to vector<1x1x8x128xf32>
    tpu.vector_store %arg5[%c0_24, %c0_25, %c0_26, %c0_27], %63 {strides = array<i32>} : memref<1x1x8x128xf32, #tpu.memory_space<vmem>>, vector<1x1x8x128xf32>,
    return
  }
  func.func @transform_0(%arg0: i32, %arg1: i32, %arg2: i32) -> (i32, i32, i32) {
    %c1_i32 = arith.constant 1 : i32
    %0 = arith.muli %arg1, %c1_i32 : i32
    %1 = arith.addi %0, %arg2 : i32
    %c0_i32 = arith.constant 0 : i32
    %2 = arith.minsi %1, %c0_i32 : i32
    %c0_i32_0 = arith.constant 0 : i32
    %c0_i32_1 = arith.constant 0 : i32
    return %arg0, %2, %c0_i32_0 : i32, i32, i32
  }
  func.func @transform_1(%arg0: i32, %arg1: i32, %arg2: i32) -> (i32, i32, i32) {
    %c1_i32 = arith.constant 1 : i32
    %0 = arith.muli %arg1, %c1_i32 : i32
    %1 = arith.addi %0, %arg2 : i32
    %c0_i32 = arith.constant 0 : i32
    %2 = arith.minsi %1, %c0_i32 : i32
    %c0_i32_0 = arith.constant 0 : i32
    %c0_i32_1 = arith.constant 0 : i32
    return %arg0, %2, %c0_i32_0 : i32, i32, i32
  }
  func.func @transform_2(%arg0: i32, %arg1: i32, %arg2: i32) -> (i32, i32, i32, i32) {
    %c0_i32 = arith.constant 0 : i32
    %c0_i32_0 = arith.constant 0 : i32
    %c0_i32_1 = arith.constant 0 : i32
    return %arg0, %arg1, %c0_i32, %c0_i32_0 : i32, i32, i32, i32
  }
}

</mosaic_0001>

<bundles_post_ra>
// kernel: stereo_metrics.1
= control target key start
LH: loop header
LB: loop body
LE: loop exit
PB: predicated region body
PF: predicated region fallthrough
CT: control target
= control target key end

     0   :  { %s515_s9 = smov 0   ;;  %s517_s10 = smov 0   ;;  %s556_s0 = inlined_call_operand.vmem [shape: f32[2,8,128], index: 0, kind: input, shape index: {}]   ;;  %s557_s1 = inlined_call_operand.vmem [shape: f32[2,8,128], index: 1, kind: input, shape index: {}]   ;;  %s558_s2 = inlined_call_operand.vmem [shape: f32[2,1,8,128], index: 2, kind: output, shape index: {}]  }
   0x1   :  { %s519_s11 = smov 0  }
   0x2 LB: > { %s31_s12 = sadd.s32 1, %s493_s10  ;;  %p439_p0 = scmp.ge.s32.totalorder %s497_s11, 1  ;;  %s497_s11 = sphi %s519_s11, %s12_s11   ;;  %s493_s10 = sphi %s517_s10, %s560_s10   ;;  %s489_s9 = sphi %s515_s9, %s559_s9  }
   0x3   : > { %p33_p1 = scmp.ge.s32.totalorder %s31_s12, 2  ;;  %p175_p2 = scmp.lt.s32.totalorder %s497_s11, 3 }
   0x5   : > { %s562_s12 = smov (%p33_p1, %s31_s12), 0  ;;  %p176_p3 = pnand %p439_p0, %p175_p2 }
   0x6   : > { %p217_p4 = scmp.lt.s32.totalorder (!%p176_p3), %s489_s9, 1  ;;  %v499_v5 = vmov (!%p176_p3), 0.0   ;;  %vm326_vm5 = vcmask (!%p176_p3), 1040384   ;;  %vm328_vm6 = vcmask (!%p176_p3), 1041408   ;;  %vm330_vm7 = vcmask (!%p176_p3), 1042432  }
   0x7   : > { %179 = sbr.rel (%p176_p3) target bundleno = 45 (0x2d), region = 28  ;;  %vm332_vm8 = vcmask (!%p176_p3), 1043456   ;;  %vm334_vm9 = vcmask (!%p176_p3), 1044480   ;;  %vm336_vm10 = vcmask (!%p176_p3), 1045504   ;;  %vm338_vm11 = vcmask (!%p176_p3), 1046528  }
   0xe   : > { %s564_s9 = smov (!%p217_p4, %s489_s9), 1 }
   0xf   : > { %s533_s13 = sshll.u32 %s564_s9, 3 }
  0x10   : > { %s223_s16 = scalar_lea.vmem %s556_s0, %s533_s13  ;;  %s236_s19 = scalar_lea.vmem %s557_s1, %s533_s13 }
  0x11   : > { %v253_v0 = vld [vmem:[%s236_s19] sm:$0xff]  ;;  %s246_s22 = scalar_lea.vmem %s558_s2, %s533_s13 }
  0x12   : > { %v254_v1 = vld [vmem:[%s223_s16] sm:$0xff]  ;;  %v255_v2 = vand.u32 2147483647, %v253_v0 }
  0x13   : > { %v266_v3 = vsub.f32 %v253_v0, %v254_v1 }
  0x14   : > { %vm256_vm0 = vcmp.lt.f32.partialorder %v255_v2, inf }
  0x15   : > { %v267_v4 = vsel %vm256_vm0, %v266_v3, 0.0  ;;  %v443_v6 = vsel %vm256_vm0, 1.0, %v499_v5 }
  0x16   : > { %v268_v7 = vand.u32 2147483647, %v267_v4  ;;  %v269_v8 = vmul.f32 %v267_v4, %v267_v4  ;;  %v272_v9 = vrot.slane %v443_v6, 4 }
  0x18   : > { %v273_v10 = vadd.f32 %v443_v6, %v272_v9  ;;  %v278_v11 = vrot.slane %v268_v7, 4  ;;  %v284_v12 = vrot.slane %v269_v8, 4  ;;  %vm290_vm1 = vcmp.gt.f32.partialorder %v268_v7, 0.5 }
  0x19   : > { %v444_v13 = vsel %vm290_vm1, 1.0, %v499_v5  ;;  %vm299_vm2 = vcmp.gt.f32.partialorder %v268_v7, 1.0  ;;  %vm308_vm3 = vcmp.gt.f32.partialorder %v268_v7, 2.0  ;;  %vm317_vm4 = vcmp.gt.f32.partialorder %v268_v7, 3.0 }
  0x1a   : > { %v274_v14 = vrot.slane %v273_v10, 2  ;;  %v285_v15 = vadd.f32 %v284_v12, %v269_v8  ;;  %v293_v16 = vrot.slane %v444_v13, 4  ;;  %v445_v17 = vsel %vm299_vm2, 1.0, %v499_v5 }
  0x1b   : > { %v302_v18 = vrot.slane %v445_v17, 4  ;;  %v446_v19 = vsel %vm308_vm3, 1.0, %v499_v5  ;;  %v279_v20 = vadd.f32 %v278_v11, %v268_v7  ;;  %v447_v21 = vsel %vm317_vm4, 1.0, %v499_v5 }
  0x1c   : > { %v275_v22 = vadd.f32 %v274_v14, %v273_v10  ;;  %v286_v23 = vrot.slane %v285_v15, 2  ;;  %v294_v24 = vadd.f32 %v444_v13, %v293_v16  ;;  %v311_v25 = vrot.slane %v446_v19, 4 }
  0x1d   : > { %v303_v26 = vadd.f32 %v445_v17, %v302_v18  ;;  %v280_v27 = vrot.slane %v279_v20, 2  ;;  %v320_v28 = vrot.slane %v447_v21, 4 }
  0x1e   : > { %v276_v29 = vrot.slane %v275_v22, 1  ;;  %v287_v30 = vadd.f32 %v286_v23, %v285_v15  ;;  %v295_v31 = vrot.slane %v294_v24, 2  ;;  %v312_v32 = vadd.f32 %v446_v19, %v311_v25 }
  0x1f   : > { %v281_v33 = vadd.f32 %v280_v27, %v279_v20  ;;  %v304_v34 = vrot.slane %v303_v26, 2  ;;  %v321_v35 = vadd.f32 %v447_v21, %v320_v28 }
  0x20   : > { %v288_v36 = vrot.slane %v287_v30, 1  ;;  %v296_v37 = vadd.f32 %v295_v31, %v294_v24  ;;  %v313_v38 = vrot.slane %v312_v32, 2  ;;  %v277_v39 = vadd.f32 %v276_v29, %v275_v22 }
  0x21   : > { %v282_v40 = vrot.slane %v281_v33, 1  ;;  %v305_v41 = vadd.f32 %v304_v34, %v303_v26  ;;  %v322_v42 = vrot.slane %v321_v35, 2 }
  0x22   : > { %v289_v43 = vadd.f32 %v288_v36, %v287_v30  ;;  %v297_v44 = vrot.slane %v296_v37, 1  ;;  %v314_v45 = vadd.f32 %v313_v38, %v312_v32 }
  0x23   : > { %v283_v46 = vadd.f32 %v282_v40, %v281_v33  ;;  %v306_v47 = vrot.slane %v305_v41, 1  ;;  %v323_v48 = vadd.f32 %v322_v42, %v321_v35 }
  0x24   : > { %v298_v49 = vadd.f32 %v297_v44, %v296_v37  ;;  %v315_v50 = vrot.slane %v314_v45, 1 }
  0x25   : > { %v307_v51 = vadd.f32 %v306_v47, %v305_v41  ;;  %v324_v52 = vrot.slane %v323_v48, 1  ;;  %v327_v53 = vsel %vm326_vm5, %v277_v39, %v283_v46 }
  0x26   : > { %v316_v54 = vadd.f32 %v315_v50, %v314_v45  ;;  %v329_v55 = vsel %vm328_vm6, %v327_v53, %v289_v43 }
  0x27   : > { %v325_v56 = vadd.f32 %v324_v52, %v323_v48  ;;  %v331_v57 = vsel %vm330_vm7, %v329_v55, %v298_v49 }
  0x28   : > { %v333_v58 = vsel %vm332_vm8, %v331_v57, %v307_v51 }
  0x29   : > { %v335_v59 = vsel %vm334_vm9, %v333_v58, %v316_v54 }
  0x2a   : > { %v337_v60 = vsel %vm336_vm10, %v335_v59, %v325_v56 }
  0x2b   : > { %v339_v61 = vsel %vm338_vm11, %v337_v60, 0.0 }
  0x2c   : > { %342 = vst [vmem:[%s246_s22] sm:$0xff] %v339_v61 }
  0x2d PF: > { %s12_s11 = sadd.s32 1, %s497_s11   ;;  %s559_s9 = smov %s493_s10 }
  0x2e   : > { %p9_p5 = scmp.ge.s32.totalorder %s12_s11, 4   ;;  %s560_s10 = smov %s562_s12 }
  0x30   :  { %11 = sbr.rel (!%p9_p5) target bundleno = 2 (0x2), region = 65 }

</bundles_post_ra>
